<compile_context>
chip_gen: v6e
topology: v6e:2x2x1
jax: 0.10.0
libtpu: 0.0.40
codegen_flags: <defaults>
</compile_context>

<pallas_src>
import jax
import jax.numpy as jnp
from jax.experimental import pallas as pl
from jax.experimental.pallas import tpu as pltpu

ROI_NUM = 128
HIDDEN = 64
NUM_CLASS = 2
BN_EPS = 1e-5

# Batch-tile sizing (per performance review):
#   g block = TB * 64 KiB, double-buffered => 2 * TB * 64 KiB of VMEM.
#   TB = 64  -> 8 MiB of pipeline buffers, ~4 MiB DMA per grid step (>85%
#   pipeline efficiency), safely inside the default scoped VMEM on v5e (16 MiB),
#   v6e (32 MiB) and v7x (32 MiB default / 64 MiB physical).
#   On v6e (128 MiB VMEM) TB can be raised to 256-512 with a larger
#   vmem_limit_bytes; keep TB <= 128-192 on v7x and <= 128 on v5e.
DEFAULT_BATCH_TILE = 64
VMEM_LIMIT_BYTES = 32 * 1024 * 1024


def gcn_base_kernel(g_ref, gcn_w_ref, gcn_b_ref,
                    bn1_scale_ref, bn1_shift_ref,
                    w1_ref, b1_ref,
                    w2_ref, b2_ref,
                    out_ref, h_ref):
    tb, R, _ = g_ref.shape

    # Lane-splat of the GCN weight column, hoisted out of the per-sample loop
    # (JAX does not CSE broadcast_in_dim, so do it once per grid step).
    w_b = jnp.broadcast_to(gcn_w_ref[...], (R, R))          # (R, R): w[k] on every lane of row k

    # --- GCN layer with identity node features: h[b, r] = sum_k A[b, r, k] * w[k] ---
    # The contraction runs over the SUBLANE axis (rows of A_b) instead of the
    # lane axis:
    #   * equal to A @ w because the adjacency is symmetric (the wrapper
    #     pre-transposes g when symmetry cannot be assumed),
    #   * a sublane reduce is ~3 XLU ops per vreg vs ~7 rotate+adds per vreg
    #     for a lane reduce, so the XLU slot no longer saturates and the
    #     kernel stays HBM-bandwidth-bound,
    #   * the (1, R) per-sample result is already lane-dense and feeds the
    #     fl1 MXU matmul with no relayout.
    # (A per-sample MXU contraction w @ A_b was considered, but reloading a
    #  fresh 128x128 RHS into the MXU for every sample costs more issue slots
    #  than this VPU multiply + sublane reduce; the MXU is still used for fl1/fl2.)
    for b in range(tb):                                      # static unroll over the batch tile
        a_b = g_ref[b]                                       # (R, R) — only 16 vregs live at a time
        h_ref[b:b + 1, :] = jnp.sum(a_b * w_b, axis=0, keepdims=True)

    h = h_ref[...]                                           # (tb, R), lane-dense

    # GCN bias + ReLU (dropout(0.3) is identity in eval mode)
    h = jnp.maximum(h + gcn_b_ref[...], 0.0)

    # bn1 (eval-mode folded affine) + ReLU
    h = jnp.maximum(h * bn1_scale_ref[...] + bn1_shift_ref[...], 0.0)

    # fl1: Linear(R -> 64) with bn2 scale/shift pre-folded into w1/b1, then ReLU
    h = jnp.dot(h, w1_ref[...], preferred_element_type=jnp.float32) + b1_ref[...]
    h = jnp.maximum(h, 0.0)

    # fl2: Linear(64 -> num_class)
    logits = jnp.dot(h, w2_ref[...], preferred_element_type=jnp.float32) + b2_ref[...]

    # softmax over classes (dim=1)
    m = jnp.max(logits, axis=-1, keepdims=True)
    e = jnp.exp(logits - m)
    out_ref[...] = e / jnp.sum(e, axis=-1, keepdims=True)


def gcn_base_forward(g, params, *, batch_tile=DEFAULT_BATCH_TILE,
                     assume_symmetric_adjacency=True):
    g = g.astype(jnp.float32)
    B, R, R2 = g.shape
    assert R == R2, "adjacency must be square"

    if not assume_symmetric_adjacency:
        # The kernel contracts over g's sublane axis (computes A^T @ w);
        # pre-transpose when A may be asymmetric so semantics stay A @ w.
        g = jnp.swapaxes(g, 1, 2)

    # Pick a batch tile that keeps the (tb, num_class) output block legal:
    # tb == B (full dim) or a multiple of 8.
    tb = min(batch_tile, B)
    if tb < B:
        tb = max(8, (tb // 8) * 8)

    num_class = params["w2"].shape[1]

    # Host-side precompute (free): GCN weight as a (R, 1) column, and fold the
    # eval-mode bn2 affine into fl1:  (x @ W1 + b1) * s2 + t2 == x @ (W1*s2) + (b1*s2 + t2).
    gcn_w_col = params["gcn_w"].reshape(R, 1)
    w1f = params["w1"] * params["bn2_scale"]
    b1f = params["b1"] * params["bn2_scale"] + params["bn2_shift"]

    ins = (g, gcn_w_col, params["gcn_b"],
           params["bn1_scale"], params["bn1_shift"],
           w1f, b1f,
           params["w2"], params["b2"])

    def resident(p):
        # Weights/BN params: constant block index -> stays resident in VMEM,
        # no re-DMA across batch tiles.
        nd = p.ndim
        return pl.BlockSpec(p.shape, lambda i, _nd=nd: (0,) * _nd)

    grid = (pl.cdiv(B, tb),)

    return pl.pallas_call(
        gcn_base_kernel,
        out_shape=jax.ShapeDtypeStruct((B, num_class), jnp.float32),
        grid=grid,
        in_specs=[pl.BlockSpec((tb, R, R), lambda i: (i, 0, 0))]
                 + [resident(p) for p in ins[1:]],
        out_specs=pl.BlockSpec((tb, num_class), lambda i: (i, 0)),
        scratch_shapes=[pltpu.VMEM((tb, R), jnp.float32)],
        compiler_params=pltpu.CompilerParams(
            # Batch tiles are independent: lets v7x shard the grid across its
            # two TensorCores (no effect on single-TC v5e/v6e).
            dimension_semantics=("parallel",),
            vmem_limit_bytes=VMEM_LIMIT_BYTES,
        ),
    )(*ins)


def init_params(key, roi_num=ROI_NUM, hidden=HIDDEN, num_class=NUM_CLASS):
    ks = jax.random.split(key, 14)

    # GCN: Linear(roi_num -> 1) weight stored as (1, roi_num), small bias.
    gcn_w = (jax.random.normal(ks[0], (1, roi_num), jnp.float32)
             / jnp.sqrt(jnp.float32(roi_num)))
    gcn_b = jax.random.normal(ks[1], (1, 1), jnp.float32) * 0.01

    # BatchNorm1d(roi_num), eval mode: fold running stats + affine into scale/shift.
    gamma1 = 1.0 + 0.1 * jax.random.normal(ks[2], (roi_num,), jnp.float32)
    beta1 = 0.1 * jax.random.normal(ks[3], (roi_num,), jnp.float32)
    mean1 = 0.1 * jax.random.normal(ks[4], (roi_num,), jnp.float32)
    var1 = jax.random.uniform(ks[5], (roi_num,), jnp.float32, 0.5, 1.5)
    inv1 = gamma1 / jnp.sqrt(var1 + BN_EPS)
    bn1_scale = inv1.reshape(1, roi_num)
    bn1_shift = (beta1 - mean1 * inv1).reshape(1, roi_num)

    # fl1: Linear(roi_num -> hidden); stored as (roi_num, hidden) = W^T.
    w1 = (jax.random.normal(ks[6], (roi_num, hidden), jnp.float32)
          / jnp.sqrt(jnp.float32(roi_num)))
    b1 = jax.random.normal(ks[7], (1, hidden), jnp.float32) * 0.01

    gamma2 = 1.0 + 0.1 * jax.random.normal(ks[8], (hidden,), jnp.float32)
    beta2 = 0.1 * jax.random.normal(ks[9], (hidden,), jnp.float32)
    mean2 = 0.1 * jax.random.normal(ks[10], (hidden,), jnp.float32)
    var2 = jax.random.uniform(ks[11], (hidden,), jnp.float32, 0.5, 1.5)
    inv2 = gamma2 / jnp.sqrt(var2 + BN_EPS)
    bn2_scale = inv2.reshape(1, hidden)
    bn2_shift = (beta2 - mean2 * inv2).reshape(1, hidden)

    # fl2: Linear(hidden -> num_class); stored as (hidden, num_class) = W^T.
    w2 = (jax.random.normal(ks[12], (hidden, num_class), jnp.float32)
          / jnp.sqrt(jnp.float32(hidden)))
    b2 = jax.random.normal(ks[13], (1, num_class), jnp.float32) * 0.01

    return dict(gcn_w=gcn_w, gcn_b=gcn_b,
                bn1_scale=bn1_scale, bn1_shift=bn1_shift,
                w1=w1, b1=b1,
                bn2_scale=bn2_scale, bn2_shift=bn2_shift,
                w2=w2, b2=b2)


def reference_forward(g, p):
    # Plain-JAX reference of the same inference-mode forward pass (A @ w form).
    h = jnp.einsum('brk,k->br', g, p["gcn_w"][0])
    h = jnp.maximum(h + p["gcn_b"][0, 0], 0.0)
    h = jnp.maximum(h * p["bn1_scale"] + p["bn1_shift"], 0.0)
    h = h @ p["w1"] + p["b1"]
    h = h * p["bn2_scale"] + p["bn2_shift"]
    h = jnp.maximum(h, 0.0)
    logits = h @ p["w2"] + p["b2"]
    return jax.nn.softmax(logits, axis=1)


if __name__ == "__main__":
    key = jax.random.PRNGKey(0)
    k_g, k_p, k_g2 = jax.random.split(key, 3)

    params = init_params(k_p)

    # Small demo batch; symmetric "connectivity" adjacency matrices, (B, R, R).
    B = 2
    a = jax.random.normal(k_g, (B, ROI_NUM, ROI_NUM), jnp.float32)
    g = 0.5 * (a + jnp.swapaxes(a, 1, 2))

    out = jax.block_until_ready(gcn_base_forward(g, params))
    ref = reference_forward(g, params)
    assert out.shape == (B, NUM_CLASS)
    assert jnp.allclose(out, ref, atol=1e-4, rtol=1e-4), "mismatch vs reference"
    assert jnp.allclose(jnp.sum(out, axis=1), 1.0, atol=1e-5), "softmax rows must sum to 1"

    # Exercise the multi-tile (pipelined, partial-grid) path as well.
    B2 = 16
    a2 = jax.random.normal(k_g2, (B2, ROI_NUM, ROI_NUM), jnp.float32)
    g2 = 0.5 * (a2 + jnp.swapaxes(a2, 1, 2))
    out2 = jax.block_until_ready(gcn_base_forward(g2, params, batch_tile=8))
    ref2 = reference_forward(g2, params)
    assert out2.shape == (B2, NUM_CLASS)
    assert jnp.allclose(out2, ref2, atol=1e-4, rtol=1e-4), "multi-tile mismatch vs reference"

    print("KERNEL_OK")
</pallas_src>

<mosaic_0001>
module attributes {stable_mosaic.version = 11 : i64} {
  func.func @gcn_base_kernel(%arg0: i32, %arg1: memref<2x128x128xf32, #tpu.memory_space<vmem>>, %arg2: memref<128x1xf32, #tpu.memory_space<vmem>>, %arg3: memref<1x1xf32, #tpu.memory_space<vmem>>, %arg4: memref<1x128xf32, #tpu.memory_space<vmem>>, %arg5: memref<1x128xf32, #tpu.memory_space<vmem>>, %arg6: memref<128x64xf32, #tpu.memory_space<vmem>>, %arg7: memref<1x64xf32, #tpu.memory_space<vmem>>, %arg8: memref<64x2xf32, #tpu.memory_space<vmem>>, %arg9: memref<1x2xf32, #tpu.memory_space<vmem>>, %arg10: memref<2x2xf32, #tpu.memory_space<vmem>>, %arg11: memref<2x128xf32, #tpu.memory_space<vmem>>) attributes {dimension_semantics = [#tpu.dimension_semantics<parallel>], iteration_bounds = array<i64: 1>, scalar_prefetch = 0 : i64, scratch_operands = 1 : i64, tpu.core_type = #tpu.core_type<tc>, window_params = [{transform_indices = @transform_0, window_bounds = array<i64: 2, 128, 128>}, {pipeline_mode = #tpu.pipeline_mode<synchronous>, transform_indices = @transform_1, window_bounds = array<i64: 128, 1>}, {pipeline_mode = #tpu.pipeline_mode<synchronous>, transform_indices = @transform_2, window_bounds = array<i64: 1, 1>}, {pipeline_mode = #tpu.pipeline_mode<synchronous>, transform_indices = @transform_3, window_bounds = array<i64: 1, 128>}, {pipeline_mode = #tpu.pipeline_mode<synchronous>, transform_indices = @transform_4, window_bounds = array<i64: 1, 128>}, {pipeline_mode = #tpu.pipeline_mode<synchronous>, transform_indices = @transform_5, window_bounds = array<i64: 128, 64>}, {pipeline_mode = #tpu.pipeline_mode<synchronous>, transform_indices = @transform_6, window_bounds = array<i64: 1, 64>}, {pipeline_mode = #tpu.pipeline_mode<synchronous>, transform_indices = @transform_7, window_bounds = array<i64: 64, 2>}, {pipeline_mode = #tpu.pipeline_mode<synchronous>, transform_indices = @transform_8, window_bounds = array<i64: 1, 2>}, {transform_indices = @transform_9, window_bounds = array<i64: 2, 2>}]} {
    %c0 = arith.constant 0 : index
    %c0_0 = arith.constant 0 : index
    %0 = vector.load %arg2[%c0, %c0_0] : memref<128x1xf32, #tpu.memory_space<vmem>>, vector<128x1xf32>
    %1 = vector.shape_cast %0 : vector<128x1xf32> to vector<128x1xf32>
    %2 = vector.broadcast %1 : vector<128x1xf32> to vector<128x128xf32>
    %c0_1 = arith.constant 0 : index
    %c0_2 = arith.constant 0 : index
    %c0_3 = arith.constant 0 : index
    %3 = vector.load %arg1[%c0_1, %c0_2, %c0_3] : memref<2x128x128xf32, #tpu.memory_space<vmem>>, vector<1x128x128xf32>
    %4 = vector.shape_cast %3 : vector<1x128x128xf32> to vector<128x128xf32>
    %5 = arith.mulf %4, %2 : vector<128x128xf32>
    %cst = arith.constant dense<0.000000e+00> : vector<128xf32>
    %6 = vector.multi_reduction <add>, %5, %cst [0] : vector<128x128xf32> to vector<128xf32>
    %7 = vector.shape_cast %6 : vector<128xf32> to vector<1x128xf32>
    %c0_4 = arith.constant 0 : index
    %c0_5 = arith.constant 0 : index
    %8 = vector.load %arg11[%c0_4, %c0_5] : memref<2x128xf32, #tpu.memory_space<vmem>>, vector<1x128xf32>
    tpu.vector_store %arg11[%c0_4, %c0_5], %7 {strides = array<i32>} : memref<2x128xf32, #tpu.memory_space<vmem>>, vector<1x128xf32>,
    %c1 = arith.constant 1 : index
    %c0_6 = arith.constant 0 : index
    %c0_7 = arith.constant 0 : index
    %9 = vector.load %arg1[%c1, %c0_6, %c0_7] : memref<2x128x128xf32, #tpu.memory_space<vmem>>, vector<1x128x128xf32>
    %10 = vector.shape_cast %9 : vector<1x128x128xf32> to vector<128x128xf32>
    %11 = arith.mulf %10, %2 : vector<128x128xf32>
    %cst_8 = arith.constant dense<0.000000e+00> : vector<128xf32>
    %12 = vector.multi_reduction <add>, %11, %cst_8 [0] : vector<128x128xf32> to vector<128xf32>
    %13 = vector.shape_cast %12 : vector<128xf32> to vector<1x128xf32>
    %c1_9 = arith.constant 1 : index
    %c0_10 = arith.constant 0 : index
    %14 = vector.load %arg11[%c1_9, %c0_10] : memref<2x128xf32, #tpu.memory_space<vmem>>, vector<1x128xf32>
    tpu.vector_store %arg11[%c1_9, %c0_10], %13 {strides = array<i32>} : memref<2x128xf32, #tpu.memory_space<vmem>>, vector<1x128xf32>,
    %c0_11 = arith.constant 0 : index
    %c0_12 = arith.constant 0 : index
    %15 = vector.load %arg11[%c0_11, %c0_12] : memref<2x128xf32, #tpu.memory_space<vmem>>, vector<2x128xf32>
    %c0_13 = arith.constant 0 : index
    %c0_14 = arith.constant 0 : index
    %16 = vector.load %arg3[%c0_13, %c0_14] : memref<1x1xf32, #tpu.memory_space<vmem>>, vector<1x1xf32>
    %17 = vector.broadcast %16 : vector<1x1xf32> to vector<2x128xf32>
    %18 = arith.addf %15, %17 : vector<2x128xf32>
    %cst_15 = arith.constant 0.000000e+00 : f32
    %19 = vector.broadcast %cst_15 : f32 to vector<2x128xf32>
    %20 = arith.maximumf %18, %19 : vector<2x128xf32>
    %c0_16 = arith.constant 0 : index
    %c0_17 = arith.constant 0 : index
    %21 = vector.load %arg4[%c0_16, %c0_17] : memref<1x128xf32, #tpu.memory_space<vmem>>, vector<1x128xf32>
    %22 = vector.broadcast %21 : vector<1x128xf32> to vector<2x128xf32>
    %23 = arith.mulf %20, %22 : vector<2x128xf32>
    %c0_18 = arith.constant 0 : index
    %c0_19 = arith.constant 0 : index
    %24 = vector.load %arg5[%c0_18, %c0_19] : memref<1x128xf32, #tpu.memory_space<vmem>>, vector<1x128xf32>
    %25 = vector.broadcast %24 : vector<1x128xf32> to vector<2x128xf32>
    %26 = arith.addf %23, %25 : vector<2x128xf32>
    %cst_20 = arith.constant 0.000000e+00 : f32
    %27 = vector.broadcast %cst_20 : f32 to vector<2x128xf32>
    %28 = arith.maximumf %26, %27 : vector<2x128xf32>
    %c0_21 = arith.constant 0 : index
    %c0_22 = arith.constant 0 : index
    %29 = vector.load %arg6[%c0_21, %c0_22] : memref<128x64xf32, #tpu.memory_space<vmem>>, vector<128x64xf32>
    %cst_23 = arith.constant dense<0.000000e+00> : vector<2x64xf32>
    %30 = tpu.matmul %28, %29, %cst_23 {dimension_numbers = #tpu.dot_dimension_numbers<[1], [0], [0], [1], [0, 0, 1, 1], [], []>} : vector<2x128xf32>, vector<128x64xf32>, vector<2x64xf32> -> vector<2x64xf32>
    %c0_24 = arith.constant 0 : index
    %c0_25 = arith.constant 0 : index
    %31 = vector.load %arg7[%c0_24, %c0_25] : memref<1x64xf32, #tpu.memory_space<vmem>>, vector<1x64xf32>
    %32 = vector.broadcast %31 : vector<1x64xf32> to vector<2x64xf32>
    %33 = arith.addf %30, %32 : vector<2x64xf32>
    %cst_26 = arith.constant 0.000000e+00 : f32
    %34 = vector.broadcast %cst_26 : f32 to vector<2x64xf32>
    %35 = arith.maximumf %33, %34 : vector<2x64xf32>
    %c0_27 = arith.constant 0 : index
    %c0_28 = arith.constant 0 : index
    %36 = vector.load %arg8[%c0_27, %c0_28] : memref<64x2xf32, #tpu.memory_space<vmem>>, vector<64x2xf32>
    %cst_29 = arith.constant dense<0.000000e+00> : vector<2x2xf32>
    %37 = tpu.matmul %35, %36, %cst_29 {dimension_numbers = #tpu.dot_dimension_numbers<[1], [0], [0], [1], [0, 0, 1, 1], [], []>} : vector<2x64xf32>, vector<64x2xf32>, vector<2x2xf32> -> vector<2x2xf32>
    %c0_30 = arith.constant 0 : index
    %c0_31 = arith.constant 0 : index
    %38 = vector.load %arg9[%c0_30, %c0_31] : memref<1x2xf32, #tpu.memory_space<vmem>>, vector<1x2xf32>
    %39 = vector.broadcast %38 : vector<1x2xf32> to vector<2x2xf32>
    %40 = arith.addf %37, %39 : vector<2x2xf32>
    %cst_32 = arith.constant dense<0xFF800000> : vector<2xf32>
    %41 = vector.multi_reduction <maximumf>, %40, %cst_32 [1] : vector<2x2xf32> to vector<2xf32>
    %42 = vector.shape_cast %41 : vector<2xf32> to vector<2x1xf32>
    %43 = vector.broadcast %42 : vector<2x1xf32> to vector<2x2xf32>
    %44 = arith.subf %40, %43 : vector<2x2xf32>
    %45 = math.exp %44 : vector<2x2xf32>
    %cst_33 = arith.constant dense<0.000000e+00> : vector<2xf32>
    %46 = vector.multi_reduction <add>, %45, %cst_33 [1] : vector<2x2xf32> to vector<2xf32>
    %47 = vector.shape_cast %46 : vector<2xf32> to vector<2x1xf32>
    %48 = vector.broadcast %47 : vector<2x1xf32> to vector<2x2xf32>
    %49 = arith.divf %45, %48 : vector<2x2xf32>
    %c0_34 = arith.constant 0 : index
    %c0_35 = arith.constant 0 : index
    %50 = vector.load %arg10[%c0_34, %c0_35] : memref<2x2xf32, #tpu.memory_space<vmem>>, vector<2x2xf32>
    tpu.vector_store %arg10[%c0_34, %c0_35], %49 {strides = array<i32>} : memref<2x2xf32, #tpu.memory_space<vmem>>, vector<2x2xf32>,
    return
  }
  func.func @transform_0(%arg0: i32) -> (i32, i32, i32) {
    %c0_i32 = arith.constant 0 : i32
    %c0_i32_0 = arith.constant 0 : i32
    %c0_i32_1 = arith.constant 0 : i32
    return %arg0, %c0_i32, %c0_i32_0 : i32, i32, i32
  }
  func.func @transform_1(%arg0: i32) -> (i32, i32) {
    %c0_i32 = arith.constant 0 : i32
    %c0_i32_0 = arith.constant 0 : i32
    %c0_i32_1 = arith.constant 0 : i32
    return %c0_i32, %c0_i32_0 : i32, i32
  }
  func.func @transform_2(%arg0: i32) -> (i32, i32) {
    %c0_i32 = arith.constant 0 : i32
    %c0_i32_0 = arith.constant 0 : i32
    %c0_i32_1 = arith.constant 0 : i32
    return %c0_i32, %c0_i32_0 : i32, i32
  }
  func.func @transform_3(%arg0: i32) -> (i32, i32) {
    %c0_i32 = arith.constant 0 : i32
    %c0_i32_0 = arith.constant 0 : i32
    %c0_i32_1 = arith.constant 0 : i32
    return %c0_i32, %c0_i32_0 : i32, i32
  }
  func.func @transform_4(%arg0: i32) -> (i32, i32) {
    %c0_i32 = arith.constant 0 : i32
    %c0_i32_0 = arith.constant 0 : i32
    %c0_i32_1 = arith.constant 0 : i32
    return %c0_i32, %c0_i32_0 : i32, i32
  }
  func.func @transform_5(%arg0: i32) -> (i32, i32) {
    %c0_i32 = arith.constant 0 : i32
    %c0_i32_0 = arith.constant 0 : i32
    %c0_i32_1 = arith.constant 0 : i32
    return %c0_i32, %c0_i32_0 : i32, i32
  }
  func.func @transform_6(%arg0: i32) -> (i32, i32) {
    %c0_i32 = arith.constant 0 : i32
    %c0_i32_0 = arith.constant 0 : i32
    %c0_i32_1 = arith.constant 0 : i32
    return %c0_i32, %c0_i32_0 : i32, i32
  }
  func.func @transform_7(%arg0: i32) -> (i32, i32) {
    %c0_i32 = arith.constant 0 : i32
    %c0_i32_0 = arith.constant 0 : i32
    %c0_i32_1 = arith.constant 0 : i32
    return %c0_i32, %c0_i32_0 : i32, i32
  }
  func.func @transform_8(%arg0: i32) -> (i32, i32) {
    %c0_i32 = arith.constant 0 : i32
    %c0_i32_0 = arith.constant 0 : i32
    %c0_i32_1 = arith.constant 0 : i32
    return %c0_i32, %c0_i32_0 : i32, i32
  }
  func.func @transform_9(%arg0: i32) -> (i32, i32) {
    %c0_i32 = arith.constant 0 : i32
    %c0_i32_0 = arith.constant 0 : i32
    return %arg0, %c0_i32 : i32, i32
  }
}

</mosaic_0001>

<bundles_post_ra>
// kernel: tpu_custom_call.1
= control target key start
LH: loop header
LB: loop body
LE: loop exit
PB: predicated region body
PF: predicated region fallthrough
CT: control target
= control target key end

     0   :  { %s931_s0 = inlined_call_operand.vmem [shape: f32[2,128,128], index: 0, kind: input, shape index: {}]   ;;  %s932_s1 = inlined_call_operand.vmem [shape: f32[128,1], index: 1, kind: input, shape index: {}]   ;;  %s933_s2 = inlined_call_operand.<no memory space> [shape: f32[1,1], index: 2, kind: input, shape index: {}]   ;;  %s934_s3 = inlined_call_operand.vmem [shape: f32[1,128], index: 3, kind: input, shape index: {}]   ;;  %s935_s4 = inlined_call_operand.vmem [shape: f32[1,128], index: 4, kind: input, shape index: {}]   ;;  %s936_s5 = inlined_call_operand.vmem [shape: f32[128,64], index: 5, kind: input, shape index: {}]   ;;  %s937_s6 = inlined_call_operand.vmem [shape: f32[1,64], index: 6, kind: input, shape index: {}]   ;;  %s938_s7 = inlined_call_operand.vmem [shape: f32[64,2], index: 7, kind: input, shape index: {}]   ;;  %s939_s8 = inlined_call_operand.vmem [shape: f32[1,2], index: 8, kind: input, shape index: {}]   ;;  %s940_s9 = inlined_call_operand.hbm [shape: f32[2,2], index: 9, kind: output, shape index: {}]  }
   0x1   :  { %v14_v0 = vstv %s933_s2 }
   0x2   :  { %15 = vst [vmem:[#allocation3] sm:$0x1] %v14_v0 }
   0x3   :  { %v37_v1 = vld [vmem:[%s932_s1 + $0x10] sm:$0xff]  ;;  %v35_v2 = vld [vmem:[%s932_s1] sm:$0xff]  ;;  %v614_v3 = vmov 0   ;;  %v38_v4 = vld [vmem:[%s932_s1 + $0x18] sm:$0xff] }
   0x4   :  { %587 = vset.pattern.permute.xlu1 %v614_v3  ;;  %586 = vset.pattern.permute.xlu0 %v614_v3  ;;  %v36_v5 = vld [vmem:[%s932_s1 + $0x8] sm:$0xff]  ;;  %v39_v7 = vld [vmem:[%s932_s1 + $0x20] sm:$0xff] }
   0x5   :  { %63 = vperm.xlu1 %587, %v37_v1   ;;  %53 = vperm.xlu0 %586, %v35_v2   ;;  %v40_v6 = vld [vmem:[%s932_s1 + $0x28] sm:$0xff] }
   0x9   :  { %68 = vperm.xlu1 %587, %v38_v4   ;;  %58 = vperm.xlu0 %586, %v36_v5  }
   0xa   :  { %16 = vsyncpa [#allocation5], 0  ;;  %v42_v8 = vld [vmem:[%s932_s1 + $0x38] sm:$0xff]  ;;  %v41_v9 = vld [vmem:[%s932_s1 + $0x30] sm:$0xff]  ;;  %v615_v19 = vmov 0.0   ;;  %vm616_vm0 = vmmov 0  }
   0xb   :  { %v44_v10 = vld [vmem:[%s932_s1 + $0x48] sm:$0xff]  ;;  %v43_v11 = vld [vmem:[%s932_s1 + $0x40] sm:$0xff]  ;;  %v46_v12 = vld [vmem:[%s932_s1 + $0x58] sm:$0xff]  ;;  %528 = vmatprep.subr.mxu0 %v615_v19  ;;  %563 = vmatprep.subr.mxu1 %v615_v19  ;;  %vm379_vm1 = vcmask 523264   ;;  %vm453_vm2 = vcmask 9216  }
   0xc   :  { %v45_v13 = vld [vmem:[%s932_s1 + $0x50] sm:$0xff]  ;;  %v48_v14 = vld [vmem:[%s932_s1 + $0x68] sm:$0xff]  ;;  %v47_v15 = vld [vmem:[%s932_s1 + $0x60] sm:$0xff]  ;;  %560 = vmatprep.mubr.msk.f32.mxu0 %vm616_vm0, %v615_v19  ;;  %579 = vmatprep.mubr.msk.f32.mxu1 %vm616_vm0, %v615_v19 }
   0xd   :  { %78 = vperm.xlu1 %587, %v40_v6   ;;  %73 = vperm.xlu0 %586, %v39_v7   ;;  %v50_v16 = vld [vmem:[%s932_s1 + $0x78] sm:$0xff]  ;;  %v49_v17 = vld [vmem:[%s932_s1 + $0x70] sm:$0xff]  ;;  %v496_v18 = vld [vmem:[#allocation3] ss:$0 sm:$0xff] }
   0xe   :  { %v285_v20 = vld [vmem:[%s936_s5 + $0x78] sm:$0xff]  ;;  %v284_v21 = vld [vmem:[%s936_s5 + $0x70] sm:$0xff]  ;;  %v283_v22 = vld [vmem:[%s936_s5 + $0x68] sm:$0xff] }
   0xf   :  { %529 = vmatpush3.msra.mxu0 %v285_v20  ;;  %v282_v23 = vld [vmem:[%s936_s5 + $0x60] sm:$0xff]  ;;  %v281_v24 = vld [vmem:[%s936_s5 + $0x58] sm:$0xff]  ;;  %v280_v25 = vld [vmem:[%s936_s5 + $0x50] sm:$0xff] }
  0x10   :  { %530 = vmatprep.subr.mxu0 %v615_v19  ;;  %v279_v26 = vld [vmem:[%s936_s5 + $0x48] sm:$0xff]  ;;  %v278_v27 = vld [vmem:[%s936_s5 + $0x40] sm:$0xff]  ;;  %v277_v28 = vld [vmem:[%s936_s5 + $0x38] sm:$0xff] }
  0x11   :  { %88 = vperm.xlu1 %587, %v42_v8   ;;  %83 = vperm.xlu0 %586, %v41_v9   ;;  %v276_v29 = vld [vmem:[%s936_s5 + $0x30] sm:$0xff]  ;;  %v275_v30 = vld [vmem:[%s936_s5 + $0x28] sm:$0xff]  ;;  %v274_v31 = vld [vmem:[%s936_s5 + $0x20] sm:$0xff] }
  0x12   :  { %531 = vmatpush3.msra.mxu0 %v284_v21  ;;  %v273_v32 = vld [vmem:[%s936_s5 + $0x18] sm:$0xff]  ;;  %v272_v33 = vld [vmem:[%s936_s5 + $0x10] sm:$0xff]  ;;  %v271_v34 = vld [vmem:[%s936_s5 + $0x8] sm:$0xff] }
  0x13   :  { %532 = vmatprep.subr.mxu0 %v615_v19  ;;  %v270_v35 = vld [vmem:[%s936_s5] sm:$0xff]  ;;  %v371_v36 = vld [vmem:[%s938_s7 + $0x38] sm:$0xff]  ;;  %v370_v37 = vld [vmem:[%s938_s7 + $0x30] sm:$0xff] }
  0x14   :  { %533 = vmatpush3.msra.mxu0 %v283_v22  ;;  %564 = vmatpush3.msra.mxu1 %v371_v36  ;;  %v369_v38 = vld [vmem:[%s938_s7 + $0x28] sm:$0xff]  ;;  %v368_v39 = vld [vmem:[%s938_s7 + $0x20] sm:$0xff]  ;;  %v367_v40 = vld [vmem:[%s938_s7 + $0x18] sm:$0xff] }
  0x15   :  { %98 = vperm.xlu1 %587, %v44_v10   ;;  %93 = vperm.xlu0 %586, %v43_v11   ;;  %v131_v43 = vld [vmem:[%s931_s0] sm:$0xff]  ;;  %v132_v45 = vld [vmem:[%s931_s0 + $0x8] sm:$0xff]  ;;  %v133_v47 = vld [vmem:[%s931_s0 + $0x10] sm:$0xff] }
  0x16   :  { %534 = vmatprep.subr.mxu0 %v615_v19  ;;  %565 = vmatprep.subr.mxu1 %v615_v19  ;;  %v480_v44 = vld [vmem:[%s931_s0 + $0x80] sm:$0xff]  ;;  %v481_v46 = vld [vmem:[%s931_s0 + $0x88] sm:$0xff]  ;;  %v482_v48 = vld [vmem:[%s931_s0 + $0x90] sm:$0xff] }
  0x17   :  { %535 = vmatpush3.msra.mxu0 %v282_v23  ;;  %566 = vmatpush3.msra.mxu1 %v370_v37  ;;  %v134_v55 = vld [vmem:[%s931_s0 + $0x18] sm:$0xff]  ;;  %v135_v62 = vld [vmem:[%s931_s0 + $0x20] sm:$0xff]  ;;  %v136_v5 = vld [vmem:[%s931_s0 + $0x28] sm:$0xff] }
  0x18   :  { %536 = vmatprep.subr.mxu0 %v615_v19  ;;  %567 = vmatprep.subr.mxu1 %v615_v19  ;;  %v483_v56 = vld [vmem:[%s931_s0 + $0x98] sm:$0xff]  ;;  %v484_v63 = vld [vmem:[%s931_s0 + $0xa0] sm:$0xff]  ;;  %v485_v6 = vld [vmem:[%s931_s0 + $0xa8] sm:$0xff] }
  0x19   :  { %108 = vperm.xlu1 %587, %v46_v12   ;;  %103 = vperm.xlu0 %586, %v45_v13   ;;  %v137_v12 = vld [vmem:[%s931_s0 + $0x30] sm:$0xff]  ;;  %v138_v20 = vld [vmem:[%s931_s0 + $0x38] sm:$0xff] }
  0x1a   :  { %537 = vmatpush3.msra.mxu0 %v281_v24  ;;  %568 = vmatpush3.msra.mxu1 %v369_v38  ;;  %v486_v13 = vld [vmem:[%s931_s0 + $0xb0] sm:$0xff]  ;;  %v487_v21 = vld [vmem:[%s931_s0 + $0xb8] sm:$0xff] }
  0x1b   :  { %538 = vmatprep.subr.mxu0 %v615_v19  ;;  %569 = vmatprep.subr.mxu1 %v615_v19 }
  0x1c   :  { %539 = vmatpush3.msra.mxu0 %v280_v25  ;;  %570 = vmatpush3.msra.mxu1 %v368_v39 }
  0x1d   :  { %118 = vperm.xlu1 %587, %v48_v14   ;;  %113 = vperm.xlu0 %586, %v47_v15  }
  0x1e   :  { %540 = vmatprep.subr.mxu0 %v615_v19  ;;  %571 = vmatprep.subr.mxu1 %v615_v19 }
  0x1f   :  { %541 = vmatpush3.msra.mxu0 %v279_v26  ;;  %572 = vmatpush3.msra.mxu1 %v367_v40 }
  0x20   :  { %542 = vmatprep.subr.mxu0 %v615_v19  ;;  %573 = vmatprep.subr.mxu1 %v615_v19 }
  0x21   :  { %128 = vperm.xlu1 %587, %v50_v16   ;;  %123 = vperm.xlu0 %586, %v49_v17  }
  0x22   :  { %543 = vmatpush3.msra.mxu0 %v278_v27  ;;  %v139_v27 = vld [vmem:[%s931_s0 + $0x40] sm:$0xff] }
  0x23   :  { %544 = vmatprep.subr.mxu0 %v615_v19 }
  0x24   :  { %545 = vmatpush3.msra.mxu0 %v277_v28  ;;  %v488_v28 = vld [vmem:[%s931_s0 + $0xc0] sm:$0xff] }
  0x25   :  { %248 = vperm.xlu0 %586, %v496_v18   ;;  %546 = vmatprep.subr.mxu0 %v615_v19 }
  0x26   :  { %547 = vmatpush3.msra.mxu0 %v276_v29 }
  0x27   :  { %548 = vmatprep.subr.mxu0 %v615_v19 }
  0x28   :  { %549 = vmatpush3.msra.mxu0 %v275_v30 }
  0x29   :  { %550 = vmatprep.subr.mxu0 %v615_v19 }
  0x2a   :  { %551 = vmatpush3.msra.mxu0 %v274_v31 }
  0x2b   :  { %552 = vmatprep.subr.mxu0 %v615_v19 }
  0x2c   :  { %553 = vmatpush3.msra.mxu0 %v273_v32 }
  0x2d   :  { %554 = vmatprep.subr.mxu0 %v615_v19 }
  0x2e   :  { %555 = vmatpush3.msra.mxu0 %v272_v33 }
  0x2f   :  { %556 = vmatprep.subr.mxu0 %v615_v19 }
  0x30   :  { %557 = vmatpush3.msra.mxu0 %v271_v34  ;;  %v140_v34 = vld [vmem:[%s931_s0 + $0x48] sm:$0xff] }
  0x31   :  { %558 = vmatprep.subr.mxu0 %v615_v19 }
  0x32   :  { %559 = vmatpush3.msra.mxu0 %v270_v35  ;;  %v489_v35 = vld [vmem:[%s931_s0 + $0xc8] sm:$0xff] }
  0x80   :  { %v64_v41 = vpop.permute.xlu1 %63  ;;  %v54_v42 = vpop.permute.xlu0 %53 }
  0x81   :  { %v147_v51 = vmul.f32 %v131_v43, %v54_v42  ;;  %v202_v52 = vmul.f32 %v480_v44, %v54_v42  ;;  %v149_v57 = vmul.f32 %v133_v47, %v64_v41  ;;  %v204_v58 = vmul.f32 %v482_v48, %v64_v41  ;;  %v141_v41 = vld [vmem:[%s931_s0 + $0x50] sm:$0xff]  ;;  %v142_v48 = vld [vmem:[%s931_s0 + $0x58] sm:$0xff] }
  0x82   :  { %v490_v42 = vld [vmem:[%s931_s0 + $0xd0] sm:$0xff] }
  0x84   :  { %v69_v49 = vpop.permute.xlu1 %68  ;;  %v59_v50 = vpop.permute.xlu0 %58 }
  0x85   :  { %v148_v53 = vmul.f32 %v132_v45, %v59_v50  ;;  %v203_v54 = vmul.f32 %v481_v46, %v59_v50  ;;  %v150_v1 = vmul.f32 %v134_v55, %v69_v49  ;;  %v205_v2 = vmul.f32 %v483_v56, %v69_v49  ;;  %v491_v49 = vld [vmem:[%s931_s0 + $0xd8] sm:$0xff]  ;;  %v143_v55 = vld [vmem:[%s931_s0 + $0x60] sm:$0xff] }
  0x86   :  { %v492_v56 = vld [vmem:[%s931_s0 + $0xe0] sm:$0xff] }
  0x87   :  { %v163_v59 = vadd.f32 %v148_v53, %v147_v51  ;;  %v218_v60 = vadd.f32 %v203_v54, %v202_v52 }
  0x88   :  { %v79_v61 = vpop.permute.xlu1 %78  ;;  %v74_v0 = vpop.permute.xlu0 %73 }
  0x89   :  { %v164_v3 = vadd.f32 %v163_v59, %v149_v57  ;;  %v219_v4 = vadd.f32 %v218_v60, %v204_v58  ;;  %v151_v9 = vmul.f32 %v135_v62, %v74_v0  ;;  %v206_v10 = vmul.f32 %v484_v63, %v74_v0  ;;  %v144_v62 = vld [vmem:[%s931_s0 + $0x68] sm:$0xff] }
  0x8a   :  { %v152_v15 = vmul.f32 %v136_v5, %v79_v61  ;;  %v207_v16 = vmul.f32 %v485_v6, %v79_v61  ;;  %v493_v63 = vld [vmem:[%s931_s0 + $0xe8] sm:$0xff]  ;;  %v494_v5 = vld [vmem:[%s931_s0 + $0xf0] sm:$0xff] }
  0x8b   :  { %v165_v7 = vadd.f32 %v164_v3, %v150_v1  ;;  %v220_v8 = vadd.f32 %v219_v4, %v205_v2  ;;  %v145_v4 = vld [vmem:[%s931_s0 + $0x70] sm:$0xff] }
  0x8c   :  { %v89_v11 = vpop.permute.xlu1 %88  ;;  %v84_v14 = vpop.permute.xlu0 %83 }
  0x8d   :  { %v166_v17 = vadd.f32 %v165_v7, %v151_v9  ;;  %v221_v18 = vadd.f32 %v220_v8, %v206_v10  ;;  %v153_v24 = vmul.f32 %v137_v12, %v84_v14  ;;  %v208_v25 = vmul.f32 %v486_v13, %v84_v14  ;;  %v495_v12 = vld [vmem:[%s931_s0 + $0xf8] sm:$0xff] }
  0x8e   :  { %v154_v30 = vmul.f32 %v138_v20, %v89_v11  ;;  %v209_v31 = vmul.f32 %v487_v21, %v89_v11  ;;  %v146_v11 = vld [vmem:[%s931_s0 + $0x78] sm:$0xff] }
  0x8f   :  { %v167_v22 = vadd.f32 %v166_v17, %v152_v15  ;;  %v222_v23 = vadd.f32 %v221_v18, %v207_v16 }
  0x90   :  { %v99_v26 = vpop.permute.xlu1 %98  ;;  %v94_v29 = vpop.permute.xlu0 %93 }
  0x91   :  { %v168_v32 = vadd.f32 %v167_v22, %v153_v24  ;;  %v223_v33 = vadd.f32 %v222_v23, %v208_v25  ;;  %v155_v38 = vmul.f32 %v139_v27, %v94_v29  ;;  %v210_v39 = vmul.f32 %v488_v28, %v94_v29 }
  0x92   :  { %v156_v44 = vmul.f32 %v140_v34, %v99_v26  ;;  %v211_v45 = vmul.f32 %v489_v35, %v99_v26 }
  0x93   :  { %v169_v36 = vadd.f32 %v168_v32, %v154_v30  ;;  %v224_v37 = vadd.f32 %v223_v33, %v209_v31 }
  0x94   :  { %v109_v40 = vpop.permute.xlu1 %108  ;;  %v104_v43 = vpop.permute.xlu0 %103 }
  0x95   :  { %v170_v46 = vadd.f32 %v169_v36, %v155_v38  ;;  %v225_v47 = vadd.f32 %v224_v37, %v210_v39  ;;  %v157_v52 = vmul.f32 %v141_v41, %v104_v43  ;;  %v212_v53 = vmul.f32 %v490_v42, %v104_v43  ;;  %v498_v42 = vld [vmem:[%s935_s4] ss:$0 sm:$0xff] }
  0x96   :  { %v158_v58 = vmul.f32 %v142_v48, %v109_v40  ;;  %v213_v59 = vmul.f32 %v491_v49, %v109_v40  ;;  %v497_v40 = vld [vmem:[%s934_s3] ss:$0 sm:$0xff] }
  0x97   :  { %v171_v50 = vadd.f32 %v170_v46, %v156_v44  ;;  %v226_v51 = vadd.f32 %v225_v47, %v211_v45  ;;  %v366_v46 = vld [vmem:[%s938_s7 + $0x10] sm:$0xff]  ;;  %v365_v47 = vld [vmem:[%s938_s7 + $0x8] sm:$0xff]  ;;  %v364_v48 = vld [vmem:[%s938_s7] sm:$0xff] }
  0x98   :  { %v119_v54 = vpop.permute.xlu1 %118  ;;  %v114_v57 = vpop.permute.xlu0 %113  ;;  %574 = vmatpush3.msra.mxu1 %v366_v46  ;;  %v499_v49 = vld [vmem:[%s937_s6] ss:$0 sm:$0xff]  ;;  %s617_s6 = smov [#allocation4]  }
  0x99   :  { %v172_v60 = vadd.f32 %v171_v50, %v157_v52  ;;  %v227_v61 = vadd.f32 %v226_v51, %v212_v53  ;;  %v159_v2 = vmul.f32 %v143_v55, %v114_v57  ;;  %v214_v3 = vmul.f32 %v492_v56, %v114_v57  ;;  %575 = vmatprep.subr.mxu1 %v615_v19  ;;  %s472_s7 = sshll.u32 %s617_s6, 4  ;;  %s473_s7 = int_to_ptr.vmem [resolvable:$true] %s472_s7 }
  0x9a   :  { %v160_v7 = vmul.f32 %v144_v62, %v119_v54  ;;  %v215_v8 = vmul.f32 %v493_v63, %v119_v54  ;;  %576 = vmatpush3.msra.mxu1 %v365_v47  ;;  %v500_v54 = vld [vmem:[%s939_s8] ss:$0 sm:$0xff]  ;;  %s592_s8 = scalar_lea.vmem %s473_s7, 32  ;;  %p597_p1 = scmp.lt.s32.totalorder %s473_s7, %s473_s7 }
  0x9b   :  { %v173_v0 = vadd.f32 %v172_v60, %v158_v58  ;;  %v228_v1 = vadd.f32 %v227_v61, %v213_v59  ;;  %577 = vmatprep.subr.mxu1 %v615_v19  ;;  %p593_p0 = scmp.ne.s32.totalorder %s473_s7, %s592_s8  ;;  %p598_p2 = scmp.lt.s32.totalorder %s592_s8, %s592_s8 }
  0x9c   :  { %v124_v6 = vpop.permute.xlu0 %123  ;;  %v129_v13 = vpop.permute.xlu1 %128  ;;  %578 = vmatpush3.msra.mxu1 %v364_v48 }
  0x9d   :  { %v174_v9 = vadd.f32 %v173_v0, %v159_v2  ;;  %v229_v10 = vadd.f32 %v228_v1, %v214_v3  ;;  %v161_v16 = vmul.f32 %v145_v4, %v124_v6  ;;  %v216_v17 = vmul.f32 %v494_v5, %v124_v6  ;;  %p599_p3 = por %p598_p2, %p597_p1 }
  0x9e   :  { %v162_v18 = vmul.f32 %v146_v11, %v129_v13  ;;  %v217_v20 = vmul.f32 %v495_v12, %v129_v13 }
  0x9f   :  { %v175_v14 = vadd.f32 %v174_v9, %v160_v7  ;;  %v230_v15 = vadd.f32 %v229_v10, %v215_v8  ;;  %p600_p4 = pnand %p599_p3, %p593_p0 }
  0xa0   :  { %v249_v38 = vpop.permute.xlu0 %248 }
  0xa1   :  { %v176_v21 = vadd.f32 %v175_v14, %v161_v16  ;;  %v231_v22 = vadd.f32 %v230_v15, %v216_v17 }
  0xa3   :  { %v177_v23 = vadd.f32 %v176_v21, %v162_v18  ;;  %v232_v24 = vadd.f32 %v231_v22, %v217_v20 }
  0xa5   :  { %v178_v25 = vrot.slane %v177_v23, 4  ;;  %v233_v26 = vrot.slane %v232_v24, 4 }
  0xa7   :  { %v179_v27 = vadd.f32 %v178_v25, %v177_v23  ;;  %v234_v28 = vadd.f32 %v233_v26, %v232_v24 }
  0xa9   :  { %v180_v29 = vrot.slane %v179_v27, 2  ;;  %v235_v30 = vrot.slane %v234_v28, 2 }
  0xab   :  { %v181_v31 = vadd.f32 %v180_v29, %v179_v27  ;;  %v236_v32 = vadd.f32 %v235_v30, %v234_v28 }
  0xad   :  { %v182_v33 = vrot.slane %v181_v31, 1  ;;  %v237_v34 = vrot.slane %v236_v32, 1 }
  0xaf   :  { %v183_v35 = vadd.f32 %v182_v33, %v181_v31  ;;  %v238_v36 = vadd.f32 %v237_v34, %v236_v32 }
  0xb1   :  { %184 = vst [vmem:[#allocation2] sm:$0x1] %v183_v35  ;;  %239 = vst [vmem:[#allocation2 + $0x1] sm:$0x1] %v238_v36 }
  0xb8   :  { %v240_v37 = vld [vmem:[#allocation2] sm:$0x3] }
  0xb9   :  { %v251_v39 = vadd.f32 %v249_v38, %v240_v37 }
  0xbb   :  { %v252_v41 = vmax.f32 %v251_v39, 0.0 }
  0xbd   :  { %v260_v43 = vmul.f32 %v497_v40, %v252_v41 }
  0xbf   :  { %v268_v44 = vadd.f32 %v498_v42, %v260_v43 }
  0xc1   :  { %v269_v45 = vmax.f32 %v268_v44, 0.0 }
  0xc3   :  { %561 = vmatmul.mubr.f32.vlgmr.msra.gmra.mxu0 %v269_v45 }
 0x183   :  { %v359_v50 = vpop.f32.mrf.mxu0 }
 0x184   :  { %v360_v51 = vadd.f32 %v499_v49, %v359_v50 }
 0x185   :  { %v562_v52 = vpop.f32.mrf.mxu0 }
 0x186   :  { %v363_v53 = vmax.f32 %v360_v51, 0.0 }
 0x188   :  { %580 = vmatmul.mubr.msk.f32.vlgmr.msra.gmra.mxu1 %vm379_vm1, %v363_v53 }
 0x248   :  { %v449_v55 = vpop.f32.mrf.mxu1 }
 0x249   :  { %v450_v56 = vadd.f32 %v500_v54, %v449_v55 }
 0x24a   :  { %v581_v57 = vpop.f32.mrf.mxu1 }
 0x24b   :  { %v454_v19 = vsel %vm453_vm2, %v450_v56, -inf }
 0x24c   :  { %455 = vmax.xlane.f32.xlu1 %v454_v19 }
 0x2d5   :  { %v456_v58 = vpop.xlane.xlu1 %455 }
 0x2d6   :  { %v457_v59 = vsub.f32 %v450_v56, %v456_v58 }
 0x2d8   :  { %v458_v60 = vmul.f32 1.442695, %v457_v59 }
 0x2da   :  { %588 = vpow2.f32 %v458_v60 }
 0x2e7   :  { %v589_v61 = vpop.eup %588 }
 0x2e8   :  { %v460_v62 = vsel %vm453_vm2, %v589_v61, 0.0 }
 0x2e9   :  { %461 = vadd.xlane.f32.xlu0 %v460_v62 }
 0x372   :  { %v462_v63 = vpop.xlane.xlu0 %461 }
 0x373   :  { %590 = vrcp.f32 %v462_v63 }
 0x380   :  { %v591_v0 = vpop.eup %590 }
 0x381   :  { %v464_v1 = vmul.f32 %v591_v0, %v589_v61 }
 0x383   :  { %465 = vst.msk [vmem:[#allocation4] sm:$0x3] %vm453_vm2, %v464_v1 }
 0x384   :  { %603 = shalt.err (!%p600_p4)
}
 0x385   :  { %475 = dma.vmem_to_hbm [thread:$0]  %s473_s7, 32, %s940_s9, [#allocation5]  }
 0x386   :  { %612 = dma.done.wait [#allocation5], 32  }
 0x387   :  { %613 = vsyncadd [#allocation5], 4294967264 }
 0x388   :  { %479 = vsyncpa [#allocation5], 1 }

</bundles_post_ra>
